<compile_context>
chip_gen: v7x
topology: tpu7x:2x2x1
jax: 0.10.0
libtpu: 0.0.40
codegen_flags: <defaults>
</compile_context>

<pallas_src>
import functools

import jax
import jax.numpy as jnp
from jax.experimental import pallas as pl
from jax.experimental.pallas import tpu as pltpu


# ----------------------------------------------------------------------------
# Pallas kernels
# ----------------------------------------------------------------------------
def _conv_mm_kernel(p_ref, w_ref, b_ref, o_ref):
    # o = relu(W @ patches + b); lane axis = rel_per_group * H * W (lane-dense)
    acc = jnp.dot(w_ref[...], p_ref[...], preferred_element_type=jnp.float32)
    o_ref[...] = jnp.maximum(acc + b_ref[...], 0.0)


def conv_mm(patches, wmat, bcol):
    """patches:(RG,CKp,L) bf16, wmat:(Cout,CKp) bf16, bcol:(Cout,1) f32 -> (RG,Cout,L) f32."""
    RG, CKp, L = patches.shape
    Cout = wmat.shape[0]
    return pl.pallas_call(
        _conv_mm_kernel,
        out_shape=jax.ShapeDtypeStruct((RG, Cout, L), jnp.float32),
        grid=(RG,),
        in_specs=[
            pl.BlockSpec((None, CKp, L), lambda g: (g, 0, 0)),
            pl.BlockSpec((Cout, CKp), lambda g: (0, 0)),
            pl.BlockSpec((Cout, 1), lambda g: (0, 0)),
        ],
        out_specs=pl.BlockSpec((None, Cout, L), lambda g: (g, 0, 0)),
        compiler_params=pltpu.CompilerParams(
            dimension_semantics=("parallel",)),
    )(patches, wmat, bcol)


def _heads_kernel(flat_ref, w1_ref, b1_ref, w2_ref, b2_ref,
                  zt_ref, s_ref, wv_ref, wt_ref, bk_ref, p_ref, f_ref):
    # Fused per-relation heads: fc1 -> relu -> fc2 -> P = fc7@Z.T + s ;
    #                           f = wvec@W.T + b.  Intermediates stay in VMEM.
    w2 = w2_ref[...]
    zt = zt_ref[...]
    h1 = jnp.dot(flat_ref[...], w1_ref[...], preferred_element_type=jnp.float32)
    h1 = jnp.maximum(h1 + b1_ref[...], 0.0)
    fc7 = jnp.dot(h1.astype(w2.dtype), w2,
                  preferred_element_type=jnp.float32) + b2_ref[...]
    p_ref[...] = jnp.dot(fc7.astype(zt.dtype), zt,
                         preferred_element_type=jnp.float32) + s_ref[...]
    f_ref[...] = jnp.dot(wv_ref[...], wt_ref[...],
                         preferred_element_type=jnp.float32) + bk_ref[...]


def relation_heads(flat, wvecs, p):
    Rp = flat.shape[0]
    Kp = p["zt_p"].shape[1]
    bf = jnp.bfloat16
    args = (flat.astype(bf), p["fc1_w"].astype(bf), p["fc1_b"],
            p["fc2_w"].astype(bf), p["fc2_b"],
            p["zt_p"].astype(bf), p["s_p"],
            wvecs.astype(bf), p["wt_p"].astype(bf), p["b_p"])
    return pl.pallas_call(
        _heads_kernel,
        out_shape=(jax.ShapeDtypeStruct((Rp, Kp), jnp.float32),
                   jax.ShapeDtypeStruct((Rp, Kp), jnp.float32)),
        grid=(1,),
        in_specs=[pl.BlockSpec(a.shape, lambda i: (0, 0)) for a in args],
        out_specs=(pl.BlockSpec((Rp, Kp), lambda i: (0, 0)),
                   pl.BlockSpec((Rp, Kp), lambda i: (0, 0))),
        compiler_params=pltpu.CompilerParams(
            dimension_semantics=("arbitrary",)),
    )(*args)


# ----------------------------------------------------------------------------
# Batched conv / pool glue (layout plumbing in plain JAX, compute in Pallas)
# ----------------------------------------------------------------------------
def conv3x3_relu_batched(h, wmat, bcol, rg):
    """h:(Rp,Cin,H,W) f32, wmat:(Cout,CKp) bf16 packed, bcol:(Cout,1) f32 -> (Rp,Cout,H,W)."""
    Rp, Cin, H, W = h.shape
    Cout, CKp = wmat.shape
    rper = Rp // rg
    CK = Cin * 9

    hp = jnp.pad(h, ((0, 0), (0, 0), (1, 1), (1, 1)))
    cols = jnp.stack([hp[:, :, dy:dy + H, dx:dx + W]
                      for dy in range(3) for dx in range(3)],
                     axis=2)                                   # (Rp,Cin,9,H,W)
    cols = cols.reshape(Rp, CK, H * W)
    cols = cols.reshape(rg, rper, CK, H * W).transpose(0, 2, 1, 3)
    cols = cols.reshape(rg, CK, rper * H * W)                  # rel on lanes
    cols = jnp.pad(cols, ((0, 0), (0, CKp - CK), (0, 0)))      # 128-pad contraction

    out = conv_mm(cols.astype(jnp.bfloat16), wmat, bcol)
    out = out.reshape(rg, Cout, rper, H, W).transpose(0, 2, 1, 3, 4)
    return out.reshape(Rp, Cout, H, W)


def maxpool2_batched(h):
    Rp, C, H, W = h.shape
    return h.reshape(Rp, C, H // 2, 2, W // 2, 2).max(axis=(3, 5))


def mini_vgg_features_batched(masked, p, rg):
    # TODO(synk): scaled-down stand-in for the pretrained torchvision vgg16
    # (1000-d) feature extractor used by VGG16PREDICATES_PRE_TRAIN.get_features.
    h = conv3x3_relu_batched(masked, p["conv1_wm"], p["conv1_bc"], rg)
    h = conv3x3_relu_batched(h, p["conv2_wm"], p["conv2_bc"], rg)
    h = maxpool2_batched(h)
    h = conv3x3_relu_batched(h, p["conv3_wm"], p["conv3_bc"], rg)
    h = conv3x3_relu_batched(h, p["conv4_wm"], p["conv4_bc"], rg)
    h = maxpool2_batched(h)
    return h.reshape(h.shape[0], -1)           # channel-major flatten, like ref


# ----------------------------------------------------------------------------
# VGG16PREDICATES forward (loss) semantics
# ----------------------------------------------------------------------------
def union_bbox(sub, obj):
    if sub.ndim == 2:
        sub = sub[0]
    if obj.ndim == 2:
        obj = obj[0]
    return jnp.stack([
        jnp.minimum(sub[0], obj[0]), jnp.minimum(sub[1], obj[1]),
        jnp.maximum(sub[2], obj[2]), jnp.maximum(sub[3], obj[3])])


@functools.partial(jax.jit, static_argnames=("n_pairs", "n_gt", "lamb1", "rg"))
def _predicates_loss(x, u_all, label_s, label_o, pi_pj, gt_k, params,
                     *, n_pairs, n_gt, lamb1, rg):
    _, _, H, W = x.shape
    K = params["Z"].shape[0]

    # union-bbox keep-mask, fused into the conv1 im2col glue (no mask kernel,
    # no extra HBM round trip of the masked feature map)
    ys = jnp.arange(H, dtype=jnp.int32)[None, :, None]
    xs = jnp.arange(W, dtype=jnp.int32)[None, None, :]
    keep = ((ys >= u_all[:, 0, None, None]) & (ys < u_all[:, 2, None, None]) &
            (xs >= u_all[:, 1, None, None]) & (xs < u_all[:, 3, None, None]))
    masked = jnp.where(keep[:, None], x[0][None], 0.0)       # (Rp, Cin, H, W)

    flat = mini_vgg_features_batched(masked, params, rg)     # (Rp, FLAT)
    wvecs = jnp.concatenate([params["w2v_obj"][label_s],
                             params["w2v_obj"][label_o]], axis=1)
    P_mat, F_mat = relation_heads(flat, wvecs, params)       # (Rp, Kp) each
    P, F = P_mat[:, :K], F_mat[:, :K]                        # drop lane padding

    # loss = func_C + lamb1 * func_L + 0   (tiny reductions stay in plain JAX)
    c_pred = (pi_pj[:, None] * P[:n_pairs] * F[:n_pairs]).reshape(-1)
    c_max = jnp.max(c_pred)
    rows = n_pairs + jnp.arange(n_gt)
    c_gt = P[rows, gt_k] * F[rows, gt_k]
    f_gt = F[rows, gt_k]
    C = jnp.sum(jnp.maximum(0.0, 1.0 - c_gt + c_max))
    L = jnp.sum(jnp.maximum(f_gt[:, None] - f_gt[None, :] + 1.0, 0.0))
    return C + lamb1 * L


def vgg16_predicates_forward(x, D_gt, detections, params, lamb1=0.05, rg=2):
    # TODO(synk): faster_rcnn.faster_rcnn.predict (external detector) has no
    # Pallas equivalent; detections are supplied as a stub (bboxes, labels, scores).
    bboxes, labels, scores = detections
    n_det = int(bboxes.shape[0])

    # every ordered pair (ii != jj) -> one relation row; static index lists,
    # gathered on device (no int(label) host syncs)
    pair_ii = [ii for ii in range(n_det) for jj in range(n_det) if ii != jj]
    pair_jj = [jj for ii in range(n_det) for jj in range(n_det) if ii != jj]
    n_pairs = len(pair_ii)
    ii = jnp.asarray(pair_ii, jnp.int32)
    jj = jnp.asarray(pair_jj, jnp.int32)
    bs, bo = bboxes[ii], bboxes[jj]
    u_pairs = jnp.concatenate([jnp.minimum(bs[:, :2], bo[:, :2]),
                               jnp.maximum(bs[:, 2:], bo[:, 2:])], axis=1)
    pi_pj = (scores[ii] * scores[jj]).astype(jnp.float32)

    # ground-truth triplets (Pi = Pj = 1)
    n_gt = len(D_gt)
    gt_i = jnp.asarray([r[0][0] for r in D_gt], jnp.int32)
    gt_j = jnp.asarray([r[0][1] for r in D_gt], jnp.int32)
    gt_k = jnp.asarray([r[0][2] for r in D_gt], jnp.int32)
    u_gt = jnp.stack([union_bbox(jnp.asarray(o1, jnp.float32),
                                 jnp.asarray(o2, jnp.float32))
                      for (_, o1, o2) in D_gt])

    u_all = jnp.concatenate([u_pairs, u_gt], axis=0).astype(jnp.int32)  # .int()
    label_s = jnp.concatenate([labels[ii].astype(jnp.int32), gt_i])
    label_o = jnp.concatenate([labels[jj].astype(jnp.int32), gt_j])

    # pad the relation batch to a multiple of the lane-group count rg
    R = n_pairs + n_gt
    Rp = ((R + rg - 1) // rg) * rg
    if Rp > R:
        pad = Rp - R
        u_all = jnp.concatenate([u_all, jnp.zeros((pad, 4), jnp.int32)])
        label_s = jnp.concatenate([label_s, jnp.zeros((pad,), jnp.int32)])
        label_o = jnp.concatenate([label_o, jnp.zeros((pad,), jnp.int32)])

    return _predicates_loss(x, u_all, label_s, label_o, pi_pj, gt_k, params,
                            n_pairs=n_pairs, n_gt=n_gt,
                            lamb1=float(lamb1), rg=rg)


# ----------------------------------------------------------------------------
# Deterministic parameter construction
# ----------------------------------------------------------------------------
def orthogonal(key, shape):
    rows, cols = shape
    big, small = max(rows, cols), min(rows, cols)
    a = jax.random.normal(key, (big, small), jnp.float32)
    q, r = jnp.linalg.qr(a)
    q = q * jnp.sign(jnp.diagonal(r))[None, :]
    if rows < cols:
        q = q.T
    return q


def _pack_conv(w, b):
    """(Cout,Cin,3,3) f32 -> lane-padded bf16 matmul weight + f32 bias column."""
    cout, cin = w.shape[0], w.shape[1]
    ck = cin * 9
    ckp = ((ck + 127) // 128) * 128
    wm = jnp.pad(w.reshape(cout, ck), ((0, 0), (0, ckp - ck))).astype(jnp.bfloat16)
    return wm, b.reshape(cout, 1).astype(jnp.float32)


def init_params(key, *, c_in, h, w, feat, n_obj, k_rel, wdim):
    keys = jax.random.split(key, 16)
    c1, c2, c3, c4 = 8, 8, 16, 16
    flat = c4 * (h // 4) * (w // 4)
    kp = ((k_rel + 127) // 128) * 128        # lane-pad the predicate axis

    def conv(kk, cout, cin):
        return 0.1 * jax.random.normal(kk, (cout, cin, 3, 3), jnp.float32)

    conv_ws = [conv(keys[0], c1, c_in), conv(keys[1], c2, c1),
               conv(keys[2], c3, c2), conv(keys[3], c4, c3)]
    conv_bs = [jnp.zeros((c,), jnp.float32) for c in (c1, c2, c3, c4)]

    Z = orthogonal(keys[6], (k_rel, feat))
    s = orthogonal(keys[7], (k_rel, 1))
    Wm = orthogonal(keys[8], (k_rel, 2 * wdim))
    b = orthogonal(keys[9], (k_rel, 1))

    def pad_k(m):
        return jnp.pad(m, ((0, kp - k_rel), (0, 0)))

    params = {
        "fc1_w": 0.05 * jax.random.normal(keys[4], (flat, 64), jnp.float32),
        "fc1_b": jnp.zeros((1, 64), jnp.float32),
        "fc2_w": 0.05 * jax.random.normal(keys[5], (64, feat), jnp.float32),
        "fc2_b": jnp.zeros((1, feat), jnp.float32),
        # VGG16PREDICATES learnable params (orthogonal init, as in init_params())
        "Z": Z, "s": s, "W": Wm, "b": b,
        # 128-lane-padded, transposed copies consumed by the fused heads kernel
        "zt_p": pad_k(Z).T,        # (feat, kp)
        "s_p": pad_k(s).T,         # (1, kp)
        "wt_p": pad_k(Wm).T,       # (2*wdim, kp)
        "b_p": pad_k(b).T,         # (1, kp)
        # synthetic word2vec['obj'] table (scaled from 300-d)
        "w2v_obj": jax.random.normal(keys[10], (n_obj, wdim), jnp.float32),
    }
    # scaled-down VGG feature extractor (stand-in for pretrained vgg16),
    # pre-packed once (padded contraction dim, bf16) for the conv matmul kernel
    for li, (wc, bc) in enumerate(zip(conv_ws, conv_bs), start=1):
        wm, bcol = _pack_conv(wc, bc)
        params[f"conv{li}_wm"] = wm
        params[f"conv{li}_bc"] = bcol
    return params


if __name__ == "__main__":
    key = jax.random.PRNGKey(0)
    B, C, H, W = 1, 4, 16, 16
    FEAT = 32                      # stand-in for VGG16's 1000-d output
    N_OBJ, K_REL, WDIM = 6, 4, 16  # stand-in for 300-d word2vec
    LAMB1 = 0.05

    k_img, k_par = jax.random.split(key)
    x = jax.random.normal(k_img, (B, C, H, W), jnp.float32)
    params = init_params(k_par, c_in=C, h=H, w=W, feat=FEAT,
                         n_obj=N_OBJ, k_rel=K_REL, wdim=WDIM)

    # Stubbed faster_rcnn detections: bboxes (y_min, x_min, y_max, x_max), labels, scores
    det_bboxes = jnp.array([[1., 2., 9., 10.],
                            [4., 3., 14., 12.],
                            [0., 5., 8., 15.]], jnp.float32)
    det_labels = jnp.array([0, 2, 4], jnp.int32)
    det_scores = jnp.array([0.9, 0.7, 0.5], jnp.float32)
    detections = (det_bboxes, det_labels, det_scores)

    # Ground-truth triplets D_gt: (R=(i, j, k), O1 bbox, O2 bbox)
    D_gt = [
        ((0, 2, 1), det_bboxes[0], det_bboxes[1]),
        ((2, 4, 3), det_bboxes[1], det_bboxes[2]),
    ]

    loss = vgg16_predicates_forward(x, D_gt, detections, params, lamb1=LAMB1)
    jax.block_until_ready(loss)
    print("KERNEL_OK")
</pallas_src>

<mosaic_0001>
module attributes {stable_mosaic.version = 11 : i64} {
  func.func @_conv_mm_kernel(%arg0: i32, %arg1: memref<1x128x1024xbf16, #tpu.memory_space<vmem>>, %arg2: memref<8x128xbf16, #tpu.memory_space<vmem>>, %arg3: memref<8x1xf32, #tpu.memory_space<vmem>>, %arg4: memref<1x8x1024xf32, #tpu.memory_space<vmem>>) attributes {dimension_semantics = [#tpu.dimension_semantics<parallel>], iteration_bounds = array<i64: 2>, scalar_prefetch = 0 : i64, scratch_operands = 0 : i64, tpu.core_type = #tpu.core_type<tc>, window_params = [{transform_indices = @transform_0, window_bounds = array<i64: 1, 128, 1024>}, {pipeline_mode = #tpu.pipeline_mode<synchronous>, transform_indices = @transform_1, window_bounds = array<i64: 8, 128>}, {pipeline_mode = #tpu.pipeline_mode<synchronous>, transform_indices = @transform_2, window_bounds = array<i64: 8, 1>}, {transform_indices = @transform_3, window_bounds = array<i64: 1, 8, 1024>}]} {
    %c0 = arith.constant 0 : index
    %c0_0 = arith.constant 0 : index
    %0 = vector.load %arg2[%c0, %c0_0] : memref<8x128xbf16, #tpu.memory_space<vmem>>, vector<8x128xbf16>
    %c0_1 = arith.constant 0 : index
    %c0_2 = arith.constant 0 : index
    %c0_3 = arith.constant 0 : index
    %1 = vector.load %arg1[%c0_1, %c0_2, %c0_3] : memref<1x128x1024xbf16, #tpu.memory_space<vmem>>, vector<1x128x1024xbf16>
    %2 = vector.shape_cast %1 : vector<1x128x1024xbf16> to vector<128x1024xbf16>
    %cst = arith.constant dense<0.000000e+00> : vector<8x1024xf32>
    %3 = tpu.matmul %0, %2, %cst {dimension_numbers = #tpu.dot_dimension_numbers<[1], [0], [0], [1], [0, 0, 1, 1], [], []>} : vector<8x128xbf16>, vector<128x1024xbf16>, vector<8x1024xf32> -> vector<8x1024xf32>
    %c0_4 = arith.constant 0 : index
    %c0_5 = arith.constant 0 : index
    %4 = vector.load %arg3[%c0_4, %c0_5] : memref<8x1xf32, #tpu.memory_space<vmem>>, vector<8x1xf32>
    %5 = vector.broadcast %4 : vector<8x1xf32> to vector<8x1024xf32>
    %6 = arith.addf %3, %5 : vector<8x1024xf32>
    %cst_6 = arith.constant 0.000000e+00 : f32
    %7 = vector.broadcast %cst_6 : f32 to vector<8x1024xf32>
    %8 = arith.maximumf %6, %7 : vector<8x1024xf32>
    %c0_7 = arith.constant 0 : index
    %c0_8 = arith.constant 0 : index
    %c0_9 = arith.constant 0 : index
    %9 = vector.load %arg4[%c0_7, %c0_8, %c0_9] : memref<1x8x1024xf32, #tpu.memory_space<vmem>>, vector<1x8x1024xf32>
    %10 = vector.shape_cast %9 : vector<1x8x1024xf32> to vector<8x1024xf32>
    %11 = vector.shape_cast %8 : vector<8x1024xf32> to vector<1x8x1024xf32>
    tpu.vector_store %arg4[%c0_7, %c0_8, %c0_9], %11 {strides = array<i32>} : memref<1x8x1024xf32, #tpu.memory_space<vmem>>, vector<1x8x1024xf32>,
    return
  }
  func.func @transform_0(%arg0: i32) -> (i32, i32, i32) {
    %c0_i32 = arith.constant 0 : i32
    %c0_i32_0 = arith.constant 0 : i32
    %c0_i32_1 = arith.constant 0 : i32
    return %arg0, %c0_i32, %c0_i32_0 : i32, i32, i32
  }
  func.func @transform_1(%arg0: i32) -> (i32, i32) {
    %c0_i32 = arith.constant 0 : i32
    %c0_i32_0 = arith.constant 0 : i32
    %c0_i32_1 = arith.constant 0 : i32
    return %c0_i32, %c0_i32_0 : i32, i32
  }
  func.func @transform_2(%arg0: i32) -> (i32, i32) {
    %c0_i32 = arith.constant 0 : i32
    %c0_i32_0 = arith.constant 0 : i32
    %c0_i32_1 = arith.constant 0 : i32
    return %c0_i32, %c0_i32_0 : i32, i32
  }
  func.func @transform_3(%arg0: i32) -> (i32, i32, i32) {
    %c0_i32 = arith.constant 0 : i32
    %c0_i32_0 = arith.constant 0 : i32
    %c0_i32_1 = arith.constant 0 : i32
    return %arg0, %c0_i32, %c0_i32_0 : i32, i32, i32
  }
}

module attributes {stable_mosaic.version = 11 : i64} {
  func.func @_conv_mm_kernel(%arg0: i32, %arg1: memref<1x128x256xbf16, #tpu.memory_space<vmem>>, %arg2: memref<16x128xbf16, #tpu.memory_space<vmem>>, %arg3: memref<16x1xf32, #tpu.memory_space<vmem>>, %arg4: memref<1x16x256xf32, #tpu.memory_space<vmem>>) attributes {dimension_semantics = [#tpu.dimension_semantics<parallel>], iteration_bounds = array<i64: 2>, scalar_prefetch = 0 : i64, scratch_operands = 0 : i64, tpu.core_type = #tpu.core_type<tc>, window_params = [{transform_indices = @transform_0, window_bounds = array<i64: 1, 128, 256>}, {pipeline_mode = #tpu.pipeline_mode<synchronous>, transform_indices = @transform_1, window_bounds = array<i64: 16, 128>}, {pipeline_mode = #tpu.pipeline_mode<synchronous>, transform_indices = @transform_2, window_bounds = array<i64: 16, 1>}, {transform_indices = @transform_3, window_bounds = array<i64: 1, 16, 256>}]} {
    %c0 = arith.constant 0 : index
    %c0_0 = arith.constant 0 : index
    %0 = vector.load %arg2[%c0, %c0_0] : memref<16x128xbf16, #tpu.memory_space<vmem>>, vector<16x128xbf16>
    %c0_1 = arith.constant 0 : index
    %c0_2 = arith.constant 0 : index
    %c0_3 = arith.constant 0 : index
    %1 = vector.load %arg1[%c0_1, %c0_2, %c0_3] : memref<1x128x256xbf16, #tpu.memory_space<vmem>>, vector<1x128x256xbf16>
    %2 = vector.shape_cast %1 : vector<1x128x256xbf16> to vector<128x256xbf16>
    %cst = arith.constant dense<0.000000e+00> : vector<16x256xf32>
    %3 = tpu.matmul %0, %2, %cst {dimension_numbers = #tpu.dot_dimension_numbers<[1], [0], [0], [1], [0, 0, 1, 1], [], []>} : vector<16x128xbf16>, vector<128x256xbf16>, vector<16x256xf32> -> vector<16x256xf32>
    %c0_4 = arith.constant 0 : index
    %c0_5 = arith.constant 0 : index
    %4 = vector.load %arg3[%c0_4, %c0_5] : memref<16x1xf32, #tpu.memory_space<vmem>>, vector<16x1xf32>
    %5 = vector.broadcast %4 : vector<16x1xf32> to vector<16x256xf32>
    %6 = arith.addf %3, %5 : vector<16x256xf32>
    %cst_6 = arith.constant 0.000000e+00 : f32
    %7 = vector.broadcast %cst_6 : f32 to vector<16x256xf32>
    %8 = arith.maximumf %6, %7 : vector<16x256xf32>
    %c0_7 = arith.constant 0 : index
    %c0_8 = arith.constant 0 : index
    %c0_9 = arith.constant 0 : index
    %9 = vector.load %arg4[%c0_7, %c0_8, %c0_9] : memref<1x16x256xf32, #tpu.memory_space<vmem>>, vector<1x16x256xf32>
    %10 = vector.shape_cast %9 : vector<1x16x256xf32> to vector<16x256xf32>
    %11 = vector.shape_cast %8 : vector<16x256xf32> to vector<1x16x256xf32>
    tpu.vector_store %arg4[%c0_7, %c0_8, %c0_9], %11 {strides = array<i32>} : memref<1x16x256xf32, #tpu.memory_space<vmem>>, vector<1x16x256xf32>,
    return
  }
  func.func @transform_0(%arg0: i32) -> (i32, i32, i32) {
    %c0_i32 = arith.constant 0 : i32
    %c0_i32_0 = arith.constant 0 : i32
    %c0_i32_1 = arith.constant 0 : i32
    return %arg0, %c0_i32, %c0_i32_0 : i32, i32, i32
  }
  func.func @transform_1(%arg0: i32) -> (i32, i32) {
    %c0_i32 = arith.constant 0 : i32
    %c0_i32_0 = arith.constant 0 : i32
    %c0_i32_1 = arith.constant 0 : i32
    return %c0_i32, %c0_i32_0 : i32, i32
  }
  func.func @transform_2(%arg0: i32) -> (i32, i32) {
    %c0_i32 = arith.constant 0 : i32
    %c0_i32_0 = arith.constant 0 : i32
    %c0_i32_1 = arith.constant 0 : i32
    return %c0_i32, %c0_i32_0 : i32, i32
  }
  func.func @transform_3(%arg0: i32) -> (i32, i32, i32) {
    %c0_i32 = arith.constant 0 : i32
    %c0_i32_0 = arith.constant 0 : i32
    %c0_i32_1 = arith.constant 0 : i32
    return %arg0, %c0_i32, %c0_i32_0 : i32, i32, i32
  }
}

module attributes {stable_mosaic.version = 11 : i64} {
  func.func @_conv_mm_kernel(%arg0: i32, %arg1: memref<1x256x256xbf16, #tpu.memory_space<vmem>>, %arg2: memref<16x256xbf16, #tpu.memory_space<vmem>>, %arg3: memref<16x1xf32, #tpu.memory_space<vmem>>, %arg4: memref<1x16x256xf32, #tpu.memory_space<vmem>>) attributes {dimension_semantics = [#tpu.dimension_semantics<parallel>], iteration_bounds = array<i64: 2>, scalar_prefetch = 0 : i64, scratch_operands = 0 : i64, tpu.core_type = #tpu.core_type<tc>, window_params = [{transform_indices = @transform_0, window_bounds = array<i64: 1, 256, 256>}, {pipeline_mode = #tpu.pipeline_mode<synchronous>, transform_indices = @transform_1, window_bounds = array<i64: 16, 256>}, {pipeline_mode = #tpu.pipeline_mode<synchronous>, transform_indices = @transform_2, window_bounds = array<i64: 16, 1>}, {transform_indices = @transform_3, window_bounds = array<i64: 1, 16, 256>}]} {
    %c0 = arith.constant 0 : index
    %c0_0 = arith.constant 0 : index
    %0 = vector.load %arg2[%c0, %c0_0] : memref<16x256xbf16, #tpu.memory_space<vmem>>, vector<16x256xbf16>
    %c0_1 = arith.constant 0 : index
    %c0_2 = arith.constant 0 : index
    %c0_3 = arith.constant 0 : index
    %1 = vector.load %arg1[%c0_1, %c0_2, %c0_3] : memref<1x256x256xbf16, #tpu.memory_space<vmem>>, vector<1x256x256xbf16>
    %2 = vector.shape_cast %1 : vector<1x256x256xbf16> to vector<256x256xbf16>
    %cst = arith.constant dense<0.000000e+00> : vector<16x256xf32>
    %3 = tpu.matmul %0, %2, %cst {dimension_numbers = #tpu.dot_dimension_numbers<[1], [0], [0], [1], [0, 0, 1, 1], [], []>} : vector<16x256xbf16>, vector<256x256xbf16>, vector<16x256xf32> -> vector<16x256xf32>
    %c0_4 = arith.constant 0 : index
    %c0_5 = arith.constant 0 : index
    %4 = vector.load %arg3[%c0_4, %c0_5] : memref<16x1xf32, #tpu.memory_space<vmem>>, vector<16x1xf32>
    %5 = vector.broadcast %4 : vector<16x1xf32> to vector<16x256xf32>
    %6 = arith.addf %3, %5 : vector<16x256xf32>
    %cst_6 = arith.constant 0.000000e+00 : f32
    %7 = vector.broadcast %cst_6 : f32 to vector<16x256xf32>
    %8 = arith.maximumf %6, %7 : vector<16x256xf32>
    %c0_7 = arith.constant 0 : index
    %c0_8 = arith.constant 0 : index
    %c0_9 = arith.constant 0 : index
    %9 = vector.load %arg4[%c0_7, %c0_8, %c0_9] : memref<1x16x256xf32, #tpu.memory_space<vmem>>, vector<1x16x256xf32>
    %10 = vector.shape_cast %9 : vector<1x16x256xf32> to vector<16x256xf32>
    %11 = vector.shape_cast %8 : vector<16x256xf32> to vector<1x16x256xf32>
    tpu.vector_store %arg4[%c0_7, %c0_8, %c0_9], %11 {strides = array<i32>} : memref<1x16x256xf32, #tpu.memory_space<vmem>>, vector<1x16x256xf32>,
    return
  }
  func.func @transform_0(%arg0: i32) -> (i32, i32, i32) {
    %c0_i32 = arith.constant 0 : i32
    %c0_i32_0 = arith.constant 0 : i32
    %c0_i32_1 = arith.constant 0 : i32
    return %arg0, %c0_i32, %c0_i32_0 : i32, i32, i32
  }
  func.func @transform_1(%arg0: i32) -> (i32, i32) {
    %c0_i32 = arith.constant 0 : i32
    %c0_i32_0 = arith.constant 0 : i32
    %c0_i32_1 = arith.constant 0 : i32
    return %c0_i32, %c0_i32_0 : i32, i32
  }
  func.func @transform_2(%arg0: i32) -> (i32, i32) {
    %c0_i32 = arith.constant 0 : i32
    %c0_i32_0 = arith.constant 0 : i32
    %c0_i32_1 = arith.constant 0 : i32
    return %c0_i32, %c0_i32_0 : i32, i32
  }
  func.func @transform_3(%arg0: i32) -> (i32, i32, i32) {
    %c0_i32 = arith.constant 0 : i32
    %c0_i32_0 = arith.constant 0 : i32
    %c0_i32_1 = arith.constant 0 : i32
    return %arg0, %c0_i32, %c0_i32_0 : i32, i32, i32
  }
}

module attributes {stable_mosaic.version = 11 : i64} {
  func.func @_heads_kernel(%arg0: i32, %arg1: memref<8x256xbf16, #tpu.memory_space<vmem>>, %arg2: memref<256x64xbf16, #tpu.memory_space<vmem>>, %arg3: memref<1x64xf32, #tpu.memory_space<vmem>>, %arg4: memref<64x32xbf16, #tpu.memory_space<vmem>>, %arg5: memref<1x32xf32, #tpu.memory_space<vmem>>, %arg6: memref<32x128xbf16, #tpu.memory_space<vmem>>, %arg7: memref<1x128xf32, #tpu.memory_space<vmem>>, %arg8: memref<8x32xbf16, #tpu.memory_space<vmem>>, %arg9: memref<32x128xbf16, #tpu.memory_space<vmem>>, %arg10: memref<1x128xf32, #tpu.memory_space<vmem>>, %arg11: memref<8x128xf32, #tpu.memory_space<vmem>>, %arg12: memref<8x128xf32, #tpu.memory_space<vmem>>) attributes {dimension_semantics = [#tpu.dimension_semantics<arbitrary>], iteration_bounds = array<i64: 1>, scalar_prefetch = 0 : i64, scratch_operands = 0 : i64, tpu.core_type = #tpu.core_type<tc>, window_params = [{pipeline_mode = #tpu.pipeline_mode<synchronous>, transform_indices = @transform_0, window_bounds = array<i64: 8, 256>}, {pipeline_mode = #tpu.pipeline_mode<synchronous>, transform_indices = @transform_1, window_bounds = array<i64: 256, 64>}, {pipeline_mode = #tpu.pipeline_mode<synchronous>, transform_indices = @transform_2, window_bounds = array<i64: 1, 64>}, {pipeline_mode = #tpu.pipeline_mode<synchronous>, transform_indices = @transform_3, window_bounds = array<i64: 64, 32>}, {pipeline_mode = #tpu.pipeline_mode<synchronous>, transform_indices = @transform_4, window_bounds = array<i64: 1, 32>}, {pipeline_mode = #tpu.pipeline_mode<synchronous>, transform_indices = @transform_5, window_bounds = array<i64: 32, 128>}, {pipeline_mode = #tpu.pipeline_mode<synchronous>, transform_indices = @transform_6, window_bounds = array<i64: 1, 128>}, {pipeline_mode = #tpu.pipeline_mode<synchronous>, transform_indices = @transform_7, window_bounds = array<i64: 8, 32>}, {pipeline_mode = #tpu.pipeline_mode<synchronous>, transform_indices = @transform_8, window_bounds = array<i64: 32, 128>}, {pipeline_mode = #tpu.pipeline_mode<synchronous>, transform_indices = @transform_9, window_bounds = array<i64: 1, 128>}, {pipeline_mode = #tpu.pipeline_mode<synchronous>, transform_indices = @transform_10, window_bounds = array<i64: 8, 128>}, {pipeline_mode = #tpu.pipeline_mode<synchronous>, transform_indices = @transform_11, window_bounds = array<i64: 8, 128>}]} {
    %c0 = arith.constant 0 : index
    %c0_0 = arith.constant 0 : index
    %0 = vector.load %arg4[%c0, %c0_0] : memref<64x32xbf16, #tpu.memory_space<vmem>>, vector<64x32xbf16>
    %c0_1 = arith.constant 0 : index
    %c0_2 = arith.constant 0 : index
    %1 = vector.load %arg6[%c0_1, %c0_2] : memref<32x128xbf16, #tpu.memory_space<vmem>>, vector<32x128xbf16>
    %c0_3 = arith.constant 0 : index
    %c0_4 = arith.constant 0 : index
    %2 = vector.load %arg1[%c0_3, %c0_4] : memref<8x256xbf16, #tpu.memory_space<vmem>>, vector<8x256xbf16>
    %c0_5 = arith.constant 0 : index
    %c0_6 = arith.constant 0 : index
    %3 = vector.load %arg2[%c0_5, %c0_6] : memref<256x64xbf16, #tpu.memory_space<vmem>>, vector<256x64xbf16>
    %cst = arith.constant dense<0.000000e+00> : vector<8x64xf32>
    %4 = tpu.matmul %2, %3, %cst {dimension_numbers = #tpu.dot_dimension_numbers<[1], [0], [0], [1], [0, 0, 1, 1], [], []>} : vector<8x256xbf16>, vector<256x64xbf16>, vector<8x64xf32> -> vector<8x64xf32>
    %c0_7 = arith.constant 0 : index
    %c0_8 = arith.constant 0 : index
    %5 = vector.load %arg3[%c0_7, %c0_8] : memref<1x64xf32, #tpu.memory_space<vmem>>, vector<1x64xf32>
    %6 = vector.broadcast %5 : vector<1x64xf32> to vector<8x64xf32>
    %7 = arith.addf %4, %6 : vector<8x64xf32>
    %cst_9 = arith.constant 0.000000e+00 : f32
    %8 = vector.broadcast %cst_9 : f32 to vector<8x64xf32>
    %9 = arith.maximumf %7, %8 : vector<8x64xf32>
    %10 = arith.truncf %9 : vector<8x64xf32> to vector<8x64xbf16>
    %cst_10 = arith.constant dense<0.000000e+00> : vector<8x32xf32>
    %11 = tpu.matmul %10, %0, %cst_10 {dimension_numbers = #tpu.dot_dimension_numbers<[1], [0], [0], [1], [0, 0, 1, 1], [], []>} : vector<8x64xbf16>, vector<64x32xbf16>, vector<8x32xf32> -> vector<8x32xf32>
    %c0_11 = arith.constant 0 : index
    %c0_12 = arith.constant 0 : index
    %12 = vector.load %arg5[%c0_11, %c0_12] : memref<1x32xf32, #tpu.memory_space<vmem>>, vector<1x32xf32>
    %13 = vector.broadcast %12 : vector<1x32xf32> to vector<8x32xf32>
    %14 = arith.addf %11, %13 : vector<8x32xf32>
    %15 = arith.truncf %14 : vector<8x32xf32> to vector<8x32xbf16>
    %cst_13 = arith.constant dense<0.000000e+00> : vector<8x128xf32>
    %16 = tpu.matmul %15, %1, %cst_13 {dimension_numbers = #tpu.dot_dimension_numbers<[1], [0], [0], [1], [0, 0, 1, 1], [], []>} : vector<8x32xbf16>, vector<32x128xbf16>, vector<8x128xf32> -> vector<8x128xf32>
    %c0_14 = arith.constant 0 : index
    %c0_15 = arith.constant 0 : index
    %17 = vector.load %arg7[%c0_14, %c0_15] : memref<1x128xf32, #tpu.memory_space<vmem>>, vector<1x128xf32>
    %18 = vector.broadcast %17 : vector<1x128xf32> to vector<8x128xf32>
    %19 = arith.addf %16, %18 : vector<8x128xf32>
    %c0_16 = arith.constant 0 : index
    %c0_17 = arith.constant 0 : index
    %20 = vector.load %arg11[%c0_16, %c0_17] : memref<8x128xf32, #tpu.memory_space<vmem>>, vector<8x128xf32>
    tpu.vector_store %arg11[%c0_16, %c0_17], %19 {strides = array<i32>} : memref<8x128xf32, #tpu.memory_space<vmem>>, vector<8x128xf32>,
    %c0_18 = arith.constant 0 : index
    %c0_19 = arith.constant 0 : index
    %21 = vector.load %arg8[%c0_18, %c0_19] : memref<8x32xbf16, #tpu.memory_space<vmem>>, vector<8x32xbf16>
    %c0_20 = arith.constant 0 : index
    %c0_21 = arith.constant 0 : index
    %22 = vector.load %arg9[%c0_20, %c0_21] : memref<32x128xbf16, #tpu.memory_space<vmem>>, vector<32x128xbf16>
    %cst_22 = arith.constant dense<0.000000e+00> : vector<8x128xf32>
    %23 = tpu.matmul %21, %22, %cst_22 {dimension_numbers = #tpu.dot_dimension_numbers<[1], [0], [0], [1], [0, 0, 1, 1], [], []>} : vector<8x32xbf16>, vector<32x128xbf16>, vector<8x128xf32> -> vector<8x128xf32>
    %c0_23 = arith.constant 0 : index
    %c0_24 = arith.constant 0 : index
    %24 = vector.load %arg10[%c0_23, %c0_24] : memref<1x128xf32, #tpu.memory_space<vmem>>, vector<1x128xf32>
    %25 = vector.broadcast %24 : vector<1x128xf32> to vector<8x128xf32>
    %26 = arith.addf %23, %25 : vector<8x128xf32>
    %c0_25 = arith.constant 0 : index
    %c0_26 = arith.constant 0 : index
    %27 = vector.load %arg12[%c0_25, %c0_26] : memref<8x128xf32, #tpu.memory_space<vmem>>, vector<8x128xf32>
    tpu.vector_store %arg12[%c0_25, %c0_26], %26 {strides = array<i32>} : memref<8x128xf32, #tpu.memory_space<vmem>>, vector<8x128xf32>,
    return
  }
  func.func @transform_0(%arg0: i32) -> (i32, i32) {
    %c0_i32 = arith.constant 0 : i32
    %c0_i32_0 = arith.constant 0 : i32
    %c0_i32_1 = arith.constant 0 : i32
    return %c0_i32, %c0_i32_0 : i32, i32
  }
  func.func @transform_1(%arg0: i32) -> (i32, i32) {
    %c0_i32 = arith.constant 0 : i32
    %c0_i32_0 = arith.constant 0 : i32
    %c0_i32_1 = arith.constant 0 : i32
    return %c0_i32, %c0_i32_0 : i32, i32
  }
  func.func @transform_2(%arg0: i32) -> (i32, i32) {
    %c0_i32 = arith.constant 0 : i32
    %c0_i32_0 = arith.constant 0 : i32
    %c0_i32_1 = arith.constant 0 : i32
    return %c0_i32, %c0_i32_0 : i32, i32
  }
  func.func @transform_3(%arg0: i32) -> (i32, i32) {
    %c0_i32 = arith.constant 0 : i32
    %c0_i32_0 = arith.constant 0 : i32
    %c0_i32_1 = arith.constant 0 : i32
    return %c0_i32, %c0_i32_0 : i32, i32
  }
  func.func @transform_4(%arg0: i32) -> (i32, i32) {
    %c0_i32 = arith.constant 0 : i32
    %c0_i32_0 = arith.constant 0 : i32
    %c0_i32_1 = arith.constant 0 : i32
    return %c0_i32, %c0_i32_0 : i32, i32
  }
  func.func @transform_5(%arg0: i32) -> (i32, i32) {
    %c0_i32 = arith.constant 0 : i32
    %c0_i32_0 = arith.constant 0 : i32
    %c0_i32_1 = arith.constant 0 : i32
    return %c0_i32, %c0_i32_0 : i32, i32
  }
  func.func @transform_6(%arg0: i32) -> (i32, i32) {
    %c0_i32 = arith.constant 0 : i32
    %c0_i32_0 = arith.constant 0 : i32
    %c0_i32_1 = arith.constant 0 : i32
    return %c0_i32, %c0_i32_0 : i32, i32
  }
  func.func @transform_7(%arg0: i32) -> (i32, i32) {
    %c0_i32 = arith.constant 0 : i32
    %c0_i32_0 = arith.constant 0 : i32
    %c0_i32_1 = arith.constant 0 : i32
    return %c0_i32, %c0_i32_0 : i32, i32
  }
  func.func @transform_8(%arg0: i32) -> (i32, i32) {
    %c0_i32 = arith.constant 0 : i32
    %c0_i32_0 = arith.constant 0 : i32
    %c0_i32_1 = arith.constant 0 : i32
    return %c0_i32, %c0_i32_0 : i32, i32
  }
  func.func @transform_9(%arg0: i32) -> (i32, i32) {
    %c0_i32 = arith.constant 0 : i32
    %c0_i32_0 = arith.constant 0 : i32
    %c0_i32_1 = arith.constant 0 : i32
    return %c0_i32, %c0_i32_0 : i32, i32
  }
  func.func @transform_10(%arg0: i32) -> (i32, i32) {
    %c0_i32 = arith.constant 0 : i32
    %c0_i32_0 = arith.constant 0 : i32
    %c0_i32_1 = arith.constant 0 : i32
    return %c0_i32, %c0_i32_0 : i32, i32
  }
  func.func @transform_11(%arg0: i32) -> (i32, i32) {
    %c0_i32 = arith.constant 0 : i32
    %c0_i32_0 = arith.constant 0 : i32
    %c0_i32_1 = arith.constant 0 : i32
    return %c0_i32, %c0_i32_0 : i32, i32
  }
}

</mosaic_0001>

<bundles_post_ra>
// kernel: _predicates_loss.5
= control target key start
LH: loop header
LB: loop body
LE: loop exit
PB: predicated region body
PF: predicated region fallthrough
CT: control target
= control target key end

     0   :  { %s914_s12 = smov 0   ;;  %s1028_s0 = inlined_call_operand.vmem [shape: bf16[2,128,1024], index: 0, kind: input, shape index: {}]   ;;  %s1029_s1 = inlined_call_operand.vmem [shape: bf16[8,128], index: 1, kind: input, shape index: {}]   ;;  %s1030_s2 = inlined_call_operand.vmem [shape: f32[8,1], index: 2, kind: input, shape index: {}]   ;;  %s1031_s3 = inlined_call_operand.vmem [shape: f32[2,8,1024], index: 3, kind: output, shape index: {}]  }
   0x1 LB: > { %s798_s13 = sadd.s32 4294967295, %s891_s12   ;;  %p802_p0 = scmp.ge.s32.totalorder %s891_s12, 1  ;;  %s891_s12 = sphi %s914_s12, %s13_s12  }
   0x2   : > { %p137_p1 = scmp.lt.s32.totalorder %s891_s12, 3 }
   0x4   : > { %p138_p2 = pnand %p802_p0, %p137_p1 }
   0x5   : > { %p161_p3 = scmp.lt.s32.totalorder (!%p138_p2), %s798_s13, 1  ;;  %v237_v0 = vld [vmem:[%s1030_s2] sm:$0xff] (!%p138_p2)  ;;  %v893_v1 = vmov (!%p138_p2), 0  }
   0x6   : > { %141 = sbr.rel (%p138_p2) target bundleno = 302 (0x12e), region = 32  ;;  %595 = vmatprep.mubr.bf16.mxu0 (!%p138_p2), %v893_v1  ;;  %636 = vmatprep.mubr.bf16.mxu1 (!%p138_p2), %v893_v1 }
   0x7   : > { %884 = vset.pattern.permute.xlu0 (!%p138_p2), %v893_v1 }
   0x8   : > { %240 = vperm.xlu0 (!%p138_p2), %884, %v237_v0  }
   0xd   : > { %s1033_s13 = smov (!%p161_p3, %s798_s13), 1 }
   0xe   : > { %s873_s16 = sshll.u32 %s1033_s13, 9  ;;  %s874_s22 = sshll.u32 %s1033_s13, 6 }
   0xf   : > { %s934_s19 = scalar_lea.vmem %s1028_s0, %s873_s16  ;;  %s1015_s25 = scalar_lea.vmem %s1031_s3, %s874_s22 }
  0x10   : > { %v173_v2 = vld [vmem:[%s934_s19] sm:$0xff]  ;;  %v174_v4 = vld [vmem:[%s934_s19 + $0x8] sm:$0xff]  ;;  %v175_v0 = vld [vmem:[%s934_s19 + $0x10] sm:$0xff] }
  0x11   : > { %v177_v3 = vld [vmem:[%s934_s19 + $0x20] sm:$0xff]  ;;  %v178_v6 = vld [vmem:[%s934_s19 + $0x28] sm:$0xff] }
  0x12   : > { %v808_v5 = vcombine.high %v173_v2, %v177_v3  ;;  %v807_v7 = vcombine.low %v173_v2, %v177_v3  ;;  %v181_v8 = vld [vmem:[%s934_s19 + $0x40] sm:$0xff]  ;;  %v810_v10 = vcombine.high %v174_v4, %v178_v6  ;;  %v809_v11 = vcombine.low %v174_v4, %v178_v6  ;;  %v182_v13 = vld [vmem:[%s934_s19 + $0x48] sm:$0xff]  ;;  %v179_v2 = vld [vmem:[%s934_s19 + $0x30] sm:$0xff] }
  0x13   : > { %v185_v9 = vld [vmem:[%s934_s19 + $0x60] sm:$0xff]  ;;  %v186_v14 = vld [vmem:[%s934_s19 + $0x68] sm:$0xff]  ;;  %v176_v3 = vld [vmem:[%s934_s19 + $0x18] sm:$0xff] }
  0x14   : > { %v816_v12 = vcombine.high %v181_v8, %v185_v9  ;;  %v189_v15 = vld [vmem:[%s934_s19 + $0x80] sm:$0xff]  ;;  %563 = vmatprep.subr.bf16.mxu0 %v808_v5  ;;  %v818_v16 = vcombine.high %v182_v13, %v186_v14  ;;  %v190_v18 = vld [vmem:[%s934_s19 + $0x88] sm:$0xff]  ;;  %604 = vmatprep.subr.bf16.mxu1 %v810_v10  ;;  %v815_v20 = vcombine.low %v181_v8, %v185_v9  ;;  %v180_v4 = vld [vmem:[%s934_s19 + $0x38] sm:$0xff] }
  0x15   : > { %v193_v17 = vld [vmem:[%s934_s19 + $0xa0] sm:$0xff]  ;;  %v194_v19 = vld [vmem:[%s934_s19 + $0xa8] sm:$0xff]  ;;  %564 = vmatpush1.bf16.msra.mxu0 %v807_v7  ;;  %605 = vmatpush1.bf16.msra.mxu1 %v809_v11  ;;  %v817_v21 = vcombine.low %v182_v13, %v186_v14  ;;  %v812_v7 = vcombine.high %v175_v0, %v179_v2  ;;  %v814_v8 = vcombine.high %v176_v3, %v180_v4  ;;  %v183_v9 = vld [vmem:[%s934_s19 + $0x50] sm:$0xff] }
  0x16   : > { %565 = vmatprep.subr.bf16.mxu0 %v816_v12  ;;  %v824_v22 = vcombine.high %v189_v15, %v193_v17  ;;  %606 = vmatprep.subr.bf16.mxu1 %v818_v16  ;;  %v826_v23 = vcombine.high %v190_v18, %v194_v19  ;;  %v197_v24 = vld [vmem:[%s934_s19 + $0xc0] sm:$0xff]  ;;  %v198_v26 = vld [vmem:[%s934_s19 + $0xc8] sm:$0xff]  ;;  %v823_v28 = vcombine.low %v189_v15, %v193_v17  ;;  %v187_v10 = vld [vmem:[%s934_s19 + $0x70] sm:$0xff] }
  0x17   : > { %v201_v25 = vld [vmem:[%s934_s19 + $0xe0] sm:$0xff]  ;;  %v202_v27 = vld [vmem:[%s934_s19 + $0xe8] sm:$0xff]  ;;  %v825_v29 = vcombine.low %v190_v18, %v194_v19  ;;  %v184_v11 = vld [vmem:[%s934_s19 + $0x58] sm:$0xff]  ;;  %v811_v14 = vcombine.low %v175_v0, %v179_v2  ;;  %v813_v15 = vcombine.low %v176_v3, %v180_v4  ;;  %v820_v16 = vcombine.high %v183_v9, %v187_v10 }
  0x18   : > { %v832_v30 = vcombine.high %v197_v24, %v201_v25  ;;  %v834_v31 = vcombine.high %v198_v26, %v202_v27  ;;  %v205_v32 = vld [vmem:[%s934_s19 + $0x100] sm:$0xff]  ;;  %v206_v34 = vld [vmem:[%s934_s19 + $0x108] sm:$0xff]  ;;  %v831_v36 = vcombine.low %v197_v24, %v201_v25  ;;  %v833_v37 = vcombine.low %v198_v26, %v202_v27  ;;  %v188_v12 = vld [vmem:[%s934_s19 + $0x78] sm:$0xff] }
  0x19   : > { %566 = vmatpush1.bf16.msra.mxu0 %v815_v20  ;;  %607 = vmatpush1.bf16.msra.mxu1 %v817_v21  ;;  %v209_v33 = vld [vmem:[%s934_s19 + $0x120] sm:$0xff]  ;;  %v210_v35 = vld [vmem:[%s934_s19 + $0x128] sm:$0xff]  ;;  %v822_v17 = vcombine.high %v184_v11, %v188_v12  ;;  %v191_v18 = vld [vmem:[%s934_s19 + $0x90] sm:$0xff] }
  0x1a   : > { %567 = vmatprep.subr.bf16.mxu0 %v824_v22  ;;  %608 = vmatprep.subr.bf16.mxu1 %v826_v23  ;;  %v840_v38 = vcombine.high %v205_v32, %v209_v33  ;;  %v842_v39 = vcombine.high %v206_v34, %v210_v35  ;;  %v213_v40 = vld [vmem:[%s934_s19 + $0x140] sm:$0xff]  ;;  %v214_v42 = vld [vmem:[%s934_s19 + $0x148] sm:$0xff]  ;;  %v839_v44 = vcombine.low %v205_v32, %v209_v33  ;;  %v195_v19 = vld [vmem:[%s934_s19 + $0xb0] sm:$0xff] }
  0x1b   : > { %v217_v41 = vld [vmem:[%s934_s19 + $0x160] sm:$0xff]  ;;  %v218_v43 = vld [vmem:[%s934_s19 + $0x168] sm:$0xff]  ;;  %v841_v45 = vcombine.low %v206_v34, %v210_v35  ;;  %v192_v20 = vld [vmem:[%s934_s19 + $0x98] sm:$0xff]  ;;  %v819_v22 = vcombine.low %v183_v9, %v187_v10  ;;  %v821_v23 = vcombine.low %v184_v11, %v188_v12  ;;  %v828_v24 = vcombine.high %v191_v18, %v195_v19 }
  0x1c   : > { %v848_v46 = vcombine.high %v213_v40, %v217_v41  ;;  %v850_v47 = vcombine.high %v214_v42, %v218_v43  ;;  %v221_v48 = vld [vmem:[%s934_s19 + $0x180] sm:$0xff]  ;;  %v222_v50 = vld [vmem:[%s934_s19 + $0x188] sm:$0xff]  ;;  %v847_v52 = vcombine.low %v213_v40, %v217_v41  ;;  %v849_v53 = vcombine.low %v214_v42, %v218_v43  ;;  %v196_v21 = vld [vmem:[%s934_s19 + $0xb8] sm:$0xff] }
  0x1d   : > { %568 = vmatpush1.bf16.msra.mxu0 %v823_v28  ;;  %609 = vmatpush1.bf16.msra.mxu1 %v825_v29  ;;  %v225_v49 = vld [vmem:[%s934_s19 + $0x1a0] sm:$0xff]  ;;  %v226_v51 = vld [vmem:[%s934_s19 + $0x1a8] sm:$0xff]  ;;  %v830_v25 = vcombine.high %v192_v20, %v196_v21  ;;  %v199_v26 = vld [vmem:[%s934_s19 + $0xd0] sm:$0xff] }
  0x1e   : > { %569 = vmatprep.subr.bf16.mxu0 %v832_v30  ;;  %610 = vmatprep.subr.bf16.mxu1 %v834_v31  ;;  %v856_v54 = vcombine.high %v221_v48, %v225_v49  ;;  %v858_v55 = vcombine.high %v222_v50, %v226_v51  ;;  %v229_v56 = vld [vmem:[%s934_s19 + $0x1c0] sm:$0xff]  ;;  %v230_v58 = vld [vmem:[%s934_s19 + $0x1c8] sm:$0xff]  ;;  %v855_v60 = vcombine.low %v221_v48, %v225_v49  ;;  %v203_v27 = vld [vmem:[%s934_s19 + $0xf0] sm:$0xff] }
  0x1f   : > { %v233_v57 = vld [vmem:[%s934_s19 + $0x1e0] sm:$0xff]  ;;  %v234_v59 = vld [vmem:[%s934_s19 + $0x1e8] sm:$0xff]  ;;  %v857_v61 = vcombine.low %v222_v50, %v226_v51  ;;  %v200_v28 = vld [vmem:[%s934_s19 + $0xd8] sm:$0xff]  ;;  %v827_v30 = vcombine.low %v191_v18, %v195_v19  ;;  %v829_v31 = vcombine.low %v192_v20, %v196_v21  ;;  %v836_v32 = vcombine.high %v199_v26, %v203_v27 }
  0x20   : > { %v864_v62 = vcombine.high %v229_v56, %v233_v57  ;;  %v866_v63 = vcombine.high %v230_v58, %v234_v59  ;;  %v863_v5 = vcombine.low %v229_v56, %v233_v57  ;;  %v865_v6 = vcombine.low %v230_v58, %v234_v59  ;;  %v979_v13 = vld [vmem:[%s1029_s1] sm:$0xf]  ;;  %v204_v29 = vld [vmem:[%s934_s19 + $0xf8] sm:$0xff]  ;;  %v207_v34 = vld [vmem:[%s934_s19 + $0x110] sm:$0xff] }
  0x21   : > { %570 = vmatpush1.bf16.msra.mxu0 %v831_v36  ;;  %611 = vmatpush1.bf16.msra.mxu1 %v833_v37  ;;  %v838_v33 = vcombine.high %v200_v28, %v204_v29  ;;  %v211_v35 = vld [vmem:[%s934_s19 + $0x130] sm:$0xff]  ;;  %v208_v36 = vld [vmem:[%s934_s19 + $0x118] sm:$0xff] }
  0x22   : > { %571 = vmatprep.subr.bf16.mxu0 %v840_v38  ;;  %612 = vmatprep.subr.bf16.mxu1 %v842_v39  ;;  %v212_v37 = vld [vmem:[%s934_s19 + $0x138] sm:$0xff]  ;;  %v835_v38 = vcombine.low %v199_v26, %v203_v27  ;;  %v844_v39 = vcombine.high %v207_v34, %v211_v35  ;;  %v215_v41 = vld [vmem:[%s934_s19 + $0x150] sm:$0xff] }
  0x23   : > { %v846_v40 = vcombine.high %v208_v36, %v212_v37  ;;  %v219_v42 = vld [vmem:[%s934_s19 + $0x170] sm:$0xff]  ;;  %v216_v43 = vld [vmem:[%s934_s19 + $0x158] sm:$0xff] }
  0x24   : > { %v223_v49 = vld [vmem:[%s934_s19 + $0x190] sm:$0xff]  ;;  %v224_v51 = vld [vmem:[%s934_s19 + $0x198] sm:$0xff] }
  0x25   : > { %572 = vmatpush1.bf16.msra.mxu0 %v839_v44  ;;  %613 = vmatpush1.bf16.msra.mxu1 %v841_v45  ;;  %v220_v44 = vld [vmem:[%s934_s19 + $0x178] sm:$0xff]  ;;  %v843_v45 = vcombine.low %v207_v34, %v211_v35  ;;  %v227_v50 = vld [vmem:[%s934_s19 + $0x1b0] sm:$0xff] }
  0x26   : > { %573 = vmatprep.subr.bf16.mxu0 %v848_v46  ;;  %614 = vmatprep.subr.bf16.mxu1 %v850_v47  ;;  %v845_v46 = vcombine.low %v208_v36, %v212_v37  ;;  %v852_v47 = vcombine.high %v215_v41, %v219_v42  ;;  %v854_v48 = vcombine.high %v216_v43, %v220_v44  ;;  %v231_v57 = vld [vmem:[%s934_s19 + $0x1d0] sm:$0xff]  ;;  %v232_v59 = vld [vmem:[%s934_s19 + $0x1d8] sm:$0xff] }
  0x27   : > { %v235_v58 = vld [vmem:[%s934_s19 + $0x1f0] sm:$0xff] }
  0x28   : > { %v867_v2 = vcombine.low %v231_v57, %v235_v58 }
  0x29   : > { %574 = vmatpush1.bf16.msra.mxu0 %v847_v52  ;;  %615 = vmatpush1.bf16.msra.mxu1 %v849_v53  ;;  %v228_v52 = vld [vmem:[%s934_s19 + $0x1b8] sm:$0xff]  ;;  %v851_v53 = vcombine.low %v215_v41, %v219_v42 }
  0x2a   : > { %575 = vmatprep.subr.bf16.mxu0 %v856_v54  ;;  %616 = vmatprep.subr.bf16.mxu1 %v858_v55  ;;  %v853_v54 = vcombine.low %v216_v43, %v220_v44  ;;  %v860_v55 = vcombine.high %v223_v49, %v227_v50  ;;  %v862_v56 = vcombine.high %v224_v51, %v228_v52 }
  0x2d   : > { %576 = vmatpush1.bf16.msra.mxu0 %v855_v60  ;;  %617 = vmatpush1.bf16.msra.mxu1 %v857_v61  ;;  %v236_v60 = vld [vmem:[%s934_s19 + $0x1f8] sm:$0xff]  ;;  %v859_v61 = vcombine.low %v223_v49, %v227_v50 }
  0x2e   : > { %577 = vmatprep.subr.bf16.mxu0 %v864_v62  ;;  %618 = vmatprep.subr.bf16.mxu1 %v866_v63  ;;  %v861_v62 = vcombine.low %v224_v51, %v228_v52  ;;  %v868_v63 = vcombine.high %v231_v57, %v235_v58  ;;  %v870_v0 = vcombine.high %v232_v59, %v236_v60 }
  0x2f   : > { %v869_v3 = vcombine.low %v232_v59, %v236_v60 }
  0x31   : > { %578 = vmatpush1.bf16.msra.mxu0 %v863_v5  ;;  %619 = vmatpush1.bf16.msra.mxu1 %v865_v6 }
  0x32   : > { %645 = vmatprep.subr.bf16.mxu0 %v812_v7  ;;  %686 = vmatprep.subr.bf16.mxu1 %v814_v8 }
  0x34   : > { %596 = vmatmul.mubr.bf16.vlgmr.msra.gmra.mrb[0].mxu0 %v979_v13  ;;  %637 = vmatmul.mubr.bf16.vlgmr.msra.gmra.mrb[0].mxu1 %v979_v13 }
  0x35   : > { %646 = vmatpush1.bf16.msra.mxu0 %v811_v14  ;;  %687 = vmatpush1.bf16.msra.mxu1 %v813_v15 }
  0x36   : > { %647 = vmatprep.subr.bf16.mxu0 %v820_v16  ;;  %688 = vmatprep.subr.bf16.mxu1 %v822_v17 }
  0x37   : > { %677 = vmatprep.mubr.bf16.mxu0 %v893_v1  ;;  %718 = vmatprep.mubr.bf16.mxu1 %v893_v1  ;;  %v837_v1 = vcombine.low %v200_v28, %v204_v29 }
  0x39   : > { %648 = vmatpush1.bf16.msra.mxu0 %v819_v22  ;;  %689 = vmatpush1.bf16.msra.mxu1 %v821_v23 }
  0x3a   : > { %649 = vmatprep.subr.bf16.mxu0 %v828_v24  ;;  %690 = vmatprep.subr.bf16.mxu1 %v830_v25 }
  0x3d   : > { %650 = vmatpush1.bf16.msra.mxu0 %v827_v30  ;;  %691 = vmatpush1.bf16.msra.mxu1 %v829_v31 }
  0x3e   : > { %651 = vmatprep.subr.bf16.mxu0 %v836_v32  ;;  %692 = vmatprep.subr.bf16.mxu1 %v838_v33 }
  0x41   : > { %652 = vmatpush1.bf16.msra.mxu0 %v835_v38  ;;  %693 = vmatpush1.bf16.msra.mxu1 %v837_v1 }
  0x42   : > { %653 = vmatprep.subr.bf16.mxu0 %v844_v39  ;;  %694 = vmatprep.subr.bf16.mxu1 %v846_v40 }
  0x45   : > { %654 = vmatpush1.bf16.msra.mxu0 %v843_v45  ;;  %695 = vmatpush1.bf16.msra.mxu1 %v845_v46 }
  0x46   : > { %655 = vmatprep.subr.bf16.mxu0 %v852_v47  ;;  %696 = vmatprep.subr.bf16.mxu1 %v854_v48 }
  0x49   : > { %656 = vmatpush1.bf16.msra.mxu0 %v851_v53  ;;  %697 = vmatpush1.bf16.msra.mxu1 %v853_v54 }
  0x4a   : > { %657 = vmatprep.subr.bf16.mxu0 %v860_v55  ;;  %698 = vmatprep.subr.bf16.mxu1 %v862_v56 }
  0x4d   : > { %658 = vmatpush1.bf16.msra.mxu0 %v859_v61  ;;  %699 = vmatpush1.bf16.msra.mxu1 %v861_v62 }
  0x4e   : > { %659 = vmatprep.subr.bf16.mxu0 %v868_v63  ;;  %700 = vmatprep.subr.bf16.mxu1 %v870_v0 }
  0x51   : > { %660 = vmatpush1.bf16.msra.mxu0 %v867_v2  ;;  %701 = vmatpush1.bf16.msra.mxu1 %v869_v3 }
  0x54   : > { %678 = vmatmul.mubr.bf16.vlgmr.msra.gmra.mrb[4].mxu0 %v979_v13  ;;  %719 = vmatmul.mubr.bf16.vlgmr.msra.gmra.mrb[4].mxu1 %v979_v13 }
  0x87   : > { %v241_v4 = vpop.permute.xlu0 %240 }
 0x107   : > { %v597_v5 = vpop.f32.mrb[0].mxu0  ;;  %v638_v6 = vpop.f32.mrb[0].mxu1 }
 0x108   : > { %v598_v7 = vadd.f32 %v597_v5, %v241_v4  ;;  %v599_v8 = vpop.f32.mrb[1].mxu0  ;;  %v639_v9 = vadd.f32 %v638_v6, %v241_v4  ;;  %v640_v11 = vpop.f32.mrb[1].mxu1 }
 0x109   : > { %v600_v10 = vadd.f32 %v599_v8, %v241_v4  ;;  %v601_v12 = vpop.f32.mrb[2].mxu0  ;;  %v641_v14 = vadd.f32 %v640_v11, %v241_v4  ;;  %v642_v15 = vpop.f32.mrb[2].mxu1 }
 0x10a   : > { %v727_v13 = vmax.f32 %v598_v7, 0.0  ;;  %v602_v16 = vpop.f32.mrb[3].mxu0  ;;  %v729_v17 = vmax.f32 %v639_v9, 0.0  ;;  %v643_v19 = vpop.f32.mrb[3].mxu1 }
 0x10b   : > { %v728_v18 = vmax.f32 %v600_v10, 0.0  ;;  %v730_v20 = vmax.f32 %v641_v14, 0.0 }
 0x10c   : > { %735 = vst [vmem:[%s1015_s25] sm:$0xff] %v727_v13  ;;  %737 = vst [vmem:[%s1015_s25 + $0x10] sm:$0xff] %v729_v17 }
 0x10d   : > { %736 = vst [vmem:[%s1015_s25 + $0x8] sm:$0xff] %v728_v18  ;;  %738 = vst [vmem:[%s1015_s25 + $0x18] sm:$0xff] %v730_v20 }
 0x127   : > { %v679_v21 = vpop.f32.mrb[4].mxu0  ;;  %v720_v23 = vpop.f32.mrb[4].mxu1 }
 0x128   : > { %v680_v22 = vadd.f32 %v679_v21, %v241_v4  ;;  %v681_v24 = vpop.f32.mrb[5].mxu0  ;;  %v721_v25 = vadd.f32 %v720_v23, %v241_v4  ;;  %v722_v27 = vpop.f32.mrb[5].mxu1 }
 0x129   : > { %v682_v26 = vadd.f32 %v681_v24, %v241_v4  ;;  %v683_v28 = vpop.f32.mrb[6].mxu0  ;;  %v723_v30 = vadd.f32 %v722_v27, %v241_v4  ;;  %v724_v31 = vpop.f32.mrb[6].mxu1 }
 0x12a   : > { %v731_v29 = vmax.f32 %v680_v22, 0.0  ;;  %v684_v32 = vpop.f32.mrb[7].mxu0  ;;  %v733_v33 = vmax.f32 %v721_v25, 0.0  ;;  %v725_v35 = vpop.f32.mrb[7].mxu1 }
 0x12b   : > { %v732_v34 = vmax.f32 %v682_v26, 0.0  ;;  %v734_v36 = vmax.f32 %v723_v30, 0.0 }
 0x12c   : > { %739 = vst [vmem:[%s1015_s25 + $0x20] sm:$0xff] %v731_v29  ;;  %741 = vst [vmem:[%s1015_s25 + $0x30] sm:$0xff] %v733_v33 }
 0x12d   : > { %740 = vst [vmem:[%s1015_s25 + $0x28] sm:$0xff] %v732_v34  ;;  %742 = vst [vmem:[%s1015_s25 + $0x38] sm:$0xff] %v734_v36 }
 0x12e PF: > { %s13_s12 = sadd.s32 1, %s891_s12  }
 0x12f   : > { %p10_p4 = scmp.ge.s32.totalorder %s13_s12, 4  }
 0x131   :  { %12 = sbr.rel (!%p10_p4) target bundleno = 1 (0x1), region = 62 }

// kernel: _predicates_loss.7
= control target key start
LH: loop header
LB: loop body
LE: loop exit
PB: predicated region body
PF: predicated region fallthrough
CT: control target
= control target key end

     0   :  { %s488_s12 = smov 0   ;;  %s536_s0 = inlined_call_operand.vmem [shape: bf16[2,128,256], index: 0, kind: input, shape index: {}]   ;;  %s537_s1 = inlined_call_operand.vmem [shape: bf16[16,128], index: 1, kind: input, shape index: {}]   ;;  %s538_s2 = inlined_call_operand.vmem [shape: f32[16,1], index: 2, kind: input, shape index: {}]   ;;  %s539_s3 = inlined_call_operand.vmem [shape: f32[2,16,256], index: 3, kind: output, shape index: {}]  }
   0x1 LB: > { %s394_s13 = sadd.s32 4294967295, %s465_s12   ;;  %p398_p0 = scmp.ge.s32.totalorder %s465_s12, 1  ;;  %s465_s12 = sphi %s488_s12, %s13_s12  }
   0x2   : > { %p137_p1 = scmp.lt.s32.totalorder %s465_s12, 3 }
   0x4   : > { %p138_p2 = pnand %p398_p0, %p137_p1 }
   0x5   : > { %p161_p3 = scmp.lt.s32.totalorder (!%p138_p2), %s394_s13, 1  ;;  %v467_v0 = vmov (!%p138_p2), 0   ;;  %v190_v1 = vld [vmem:[%s538_s2] sm:$0xff] (!%p138_p2)  ;;  %v191_v2 = vld [vmem:[%s538_s2 + $0x8] sm:$0xff] (!%p138_p2) }
   0x6   : > { %141 = sbr.rel (%p138_p2) target bundleno = 269 (0x10d), region = 32  ;;  %320 = vmatprep.mubr.bf16.mxu0 (!%p138_p2), %v467_v0  ;;  %433 = vset.pattern.permute.xlu0 (!%p138_p2), %v467_v0  ;;  %v458_v19 = vld [vmem:[%s537_s1] sm:$0xff] (!%p138_p2)  }
   0x7   : > { %194 = vperm.xlu0 (!%p138_p2), %433, %v190_v1  }
   0xb   : > { %199 = vperm.xlu0 (!%p138_p2), %433, %v191_v2  }
   0xd   : > { %s541_s13 = smov (!%p161_p3, %s394_s13), 1 }
   0xe   : > { %s422_s18 = sshll.u32 %s541_s13, 7  ;;  %s423_s24 = sshll.u32 %s541_s13, 5 }
   0xf   : > { %s508_s21 = scalar_lea.vmem %s536_s0, %s422_s18  ;;  %s170_s27 = scalar_lea.vmem %s539_s3, %s423_s24 }
  0x10   : > { %v434_v3 = vld [vmem:[%s508_s21 + $0x4] ss:$8 sps:$4 sm:$0xff]   ;;  %v436_v4 = vld [vmem:[%s508_s21] ss:$8 sps:$4 sm:$0xff]   ;;  %v437_v5 = vld [vmem:[%s508_s21 + $0x14] ss:$8 sps:$4 sm:$0xff]  }
  0x11   : > { %288 = vmatprep.subr.bf16.mxu0 %v434_v3  ;;  %v439_v6 = vld [vmem:[%s508_s21 + $0x10] ss:$8 sps:$4 sm:$0xff]   ;;  %v440_v7 = vld [vmem:[%s508_s21 + $0x24] ss:$8 sps:$4 sm:$0xff]   ;;  %v442_v8 = vld [vmem:[%s508_s21 + $0x20] ss:$8 sps:$4 sm:$0xff]  }
  0x12   : > { %289 = vmatpush1.bf16.msra.mxu0 %v436_v4  ;;  %v443_v9 = vld [vmem:[%s508_s21 + $0x34] ss:$8 sps:$4 sm:$0xff]   ;;  %v445_v10 = vld [vmem:[%s508_s21 + $0x30] ss:$8 sps:$4 sm:$0xff]   ;;  %v446_v11 = vld [vmem:[%s508_s21 + $0x44] ss:$8 sps:$4 sm:$0xff]  }
  0x13   : > { %290 = vmatprep.subr.bf16.mxu0 %v437_v5  ;;  %v448_v12 = vld [vmem:[%s508_s21 + $0x40] ss:$8 sps:$4 sm:$0xff]   ;;  %v449_v13 = vld [vmem:[%s508_s21 + $0x54] ss:$8 sps:$4 sm:$0xff]   ;;  %v451_v14 = vld [vmem:[%s508_s21 + $0x50] ss:$8 sps:$4 sm:$0xff]  }
  0x14   : > { %v452_v15 = vld [vmem:[%s508_s21 + $0x64] ss:$8 sps:$4 sm:$0xff]   ;;  %v454_v16 = vld [vmem:[%s508_s21 + $0x60] ss:$8 sps:$4 sm:$0xff]   ;;  %v455_v17 = vld [vmem:[%s508_s21 + $0x74] ss:$8 sps:$4 sm:$0xff]  }
  0x15   : > { %v457_v18 = vld [vmem:[%s508_s21 + $0x70] ss:$8 sps:$4 sm:$0xff]  }
  0x16   : > { %291 = vmatpush1.bf16.msra.mxu0 %v439_v6 }
  0x17   : > { %292 = vmatprep.subr.bf16.mxu0 %v440_v7 }
  0x1a   : > { %293 = vmatpush1.bf16.msra.mxu0 %v442_v8 }
  0x1b   : > { %294 = vmatprep.subr.bf16.mxu0 %v443_v9 }
  0x1e   : > { %295 = vmatpush1.bf16.msra.mxu0 %v445_v10 }
  0x1f   : > { %296 = vmatprep.subr.bf16.mxu0 %v446_v11 }
  0x22   : > { %297 = vmatpush1.bf16.msra.mxu0 %v448_v12 }
  0x23   : > { %298 = vmatprep.subr.bf16.mxu0 %v449_v13 }
  0x26   : > { %299 = vmatpush1.bf16.msra.mxu0 %v451_v14 }
  0x27   : > { %300 = vmatprep.subr.bf16.mxu0 %v452_v15 }
  0x2a   : > { %301 = vmatpush1.bf16.msra.mxu0 %v454_v16 }
  0x2b   : > { %302 = vmatprep.subr.bf16.mxu0 %v455_v17 }
  0x2e   : > { %303 = vmatpush1.bf16.msra.mxu0 %v457_v18 }
  0x31   : > { %321 = vmatmul.mubr.bf16.vlgmr.msra.gmra.mrb[0].mxu0 %v458_v19 }
  0x86   : > { %v195_v20 = vpop.permute.xlu0 %194 }
  0x8a   : > { %v200_v24 = vpop.permute.xlu0 %199 }
 0x104   : > { %v322_v21 = vpop.f32.mrb[0].mxu0 }
 0x105   : > { %v323_v22 = vadd.f32 %v322_v21, %v195_v20  ;;  %v324_v23 = vpop.f32.mrb[1].mxu0 }
 0x106   : > { %v325_v25 = vadd.f32 %v324_v23, %v195_v20  ;;  %v326_v26 = vpop.f32.mrb[2].mxu0 }
 0x107   : > { %v331_v27 = vmax.f32 %v323_v22, 0.0  ;;  %v327_v28 = vadd.f32 %v326_v26, %v200_v24  ;;  %v328_v29 = vpop.f32.mrb[3].mxu0 }
 0x108   : > { %v332_v30 = vmax.f32 %v325_v25, 0.0  ;;  %v329_v31 = vadd.f32 %v328_v29, %v200_v24 }
 0x109   : > { %335 = vst [vmem:[%s170_s27] sm:$0xff] %v331_v27  ;;  %v333_v32 = vmax.f32 %v327_v28, 0.0 }
 0x10a   : > { %336 = vst [vmem:[%s170_s27 + $0x8] sm:$0xff] %v332_v30  ;;  %v334_v33 = vmax.f32 %v329_v31, 0.0 }
 0x10b   : > { %337 = vst [vmem:[%s170_s27 + $0x10] sm:$0xff] %v333_v32 }
 0x10c   : > { %338 = vst [vmem:[%s170_s27 + $0x18] sm:$0xff] %v334_v33 }
 0x10d PF: > { %s13_s12 = sadd.s32 1, %s465_s12  }
 0x10e   : > { %p10_p4 = scmp.ge.s32.totalorder %s13_s12, 4  }
 0x110   :  { %12 = sbr.rel (!%p10_p4) target bundleno = 1 (0x1), region = 62 }

// kernel: _predicates_loss.8
= control target key start
LH: loop header
LB: loop body
LE: loop exit
PB: predicated region body
PF: predicated region fallthrough
CT: control target
= control target key end

     0   :  { %s630_s12 = smov 0   ;;  %s697_s0 = inlined_call_operand.vmem [shape: bf16[2,256,256], index: 0, kind: input, shape index: {}]   ;;  %s698_s1 = inlined_call_operand.vmem [shape: bf16[16,256], index: 1, kind: input, shape index: {}]   ;;  %s699_s2 = inlined_call_operand.vmem [shape: f32[16,1], index: 2, kind: input, shape index: {}]   ;;  %s700_s3 = inlined_call_operand.vmem [shape: f32[2,16,256], index: 3, kind: output, shape index: {}]  }
   0x1 LB: > { %s493_s13 = sadd.s32 4294967295, %s607_s12   ;;  %p497_p0 = scmp.ge.s32.totalorder %s607_s12, 1  ;;  %s607_s12 = sphi %s630_s12, %s13_s12  }
   0x2   : > { %p137_p1 = scmp.lt.s32.totalorder %s607_s12, 3 }
   0x4   : > { %p138_p2 = pnand %p497_p0, %p137_p1 }
   0x5   : > { %p161_p3 = scmp.lt.s32.totalorder (!%p138_p2), %s493_s13, 1  ;;  %v600_v0 = vld [vmem:[%s698_s1 + $0x4] ss:$8 sps:$4 sm:$0xff] (!%p138_p2)   ;;  %v609_v1 = vmov (!%p138_p2), 0   ;;  %v598_v36 = vld [vmem:[%s698_s1] ss:$8 sps:$4 sm:$0xff] (!%p138_p2)  }
   0x6   : > { %141 = sbr.rel (%p138_p2) target bundleno = 301 (0x12d), region = 32  ;;  %549 = vset.pattern.permute.xlu0 (!%p138_p2), %v609_v1  ;;  %v205_v2 = vld [vmem:[%s699_s2] sm:$0xff] (!%p138_p2)  ;;  %419 = vmatprep.mubr.bf16.mxu0 (!%p138_p2), %v600_v0  ;;  %v206_v3 = vld [vmem:[%s699_s2 + $0x8] sm:$0xff] (!%p138_p2) }
   0x7   : > { %209 = vperm.xlu0 (!%p138_p2), %549, %v205_v2  }
   0xb   : > { %214 = vperm.xlu0 (!%p138_p2), %549, %v206_v3  }
   0xd   : > { %s702_s13 = smov (!%p161_p3, %s493_s13), 1 }
   0xe   : > { %s538_s20 = sshll.u32 %s702_s13, 8  ;;  %s539_s26 = sshll.u32 %s702_s13, 5 }
   0xf   : > { %s653_s23 = scalar_lea.vmem %s697_s0, %s538_s20  ;;  %s170_s29 = scalar_lea.vmem %s700_s3, %s539_s26 }
  0x10   : > { %v550_v4 = vld [vmem:[%s653_s23 + $0x4] ss:$8 sps:$4 sm:$0xff]   ;;  %v552_v5 = vld [vmem:[%s653_s23] ss:$8 sps:$4 sm:$0xff]   ;;  %v553_v6 = vld [vmem:[%s653_s23 + $0x14] ss:$8 sps:$4 sm:$0xff]  }
  0x11   : > { %387 = vmatprep.subr.bf16.mxu0 %v550_v4  ;;  %v555_v7 = vld [vmem:[%s653_s23 + $0x10] ss:$8 sps:$4 sm:$0xff]   ;;  %v556_v8 = vld [vmem:[%s653_s23 + $0x24] ss:$8 sps:$4 sm:$0xff]   ;;  %v558_v9 = vld [vmem:[%s653_s23 + $0x20] ss:$8 sps:$4 sm:$0xff]  }
  0x12   : > { %388 = vmatpush1.bf16.msra.mxu0 %v552_v5  ;;  %v559_v10 = vld [vmem:[%s653_s23 + $0x34] ss:$8 sps:$4 sm:$0xff]   ;;  %v561_v11 = vld [vmem:[%s653_s23 + $0x30] ss:$8 sps:$4 sm:$0xff]   ;;  %v562_v12 = vld [vmem:[%s653_s23 + $0x44] ss:$8 sps:$4 sm:$0xff]  }
  0x13   : > { %389 = vmatprep.subr.bf16.mxu0 %v553_v6  ;;  %v564_v13 = vld [vmem:[%s653_s23 + $0x40] ss:$8 sps:$4 sm:$0xff]   ;;  %v565_v14 = vld [vmem:[%s653_s23 + $0x54] ss:$8 sps:$4 sm:$0xff]   ;;  %v567_v15 = vld [vmem:[%s653_s23 + $0x50] ss:$8 sps:$4 sm:$0xff]  }
  0x14   : > { %v568_v16 = vld [vmem:[%s653_s23 + $0x64] ss:$8 sps:$4 sm:$0xff]   ;;  %v570_v17 = vld [vmem:[%s653_s23 + $0x60] ss:$8 sps:$4 sm:$0xff]   ;;  %v571_v18 = vld [vmem:[%s653_s23 + $0x74] ss:$8 sps:$4 sm:$0xff]  }
  0x15   : > { %v573_v19 = vld [vmem:[%s653_s23 + $0x70] ss:$8 sps:$4 sm:$0xff]   ;;  %v574_v20 = vld [vmem:[%s653_s23 + $0x84] ss:$8 sps:$4 sm:$0xff]   ;;  %v576_v21 = vld [vmem:[%s653_s23 + $0x80] ss:$8 sps:$4 sm:$0xff]  }
  0x16   : > { %390 = vmatpush1.bf16.msra.mxu0 %v555_v7  ;;  %v577_v22 = vld [vmem:[%s653_s23 + $0x94] ss:$8 sps:$4 sm:$0xff]   ;;  %v579_v23 = vld [vmem:[%s653_s23 + $0x90] ss:$8 sps:$4 sm:$0xff]   ;;  %v580_v24 = vld [vmem:[%s653_s23 + $0xa4] ss:$8 sps:$4 sm:$0xff]  }
  0x17   : > { %391 = vmatprep.subr.bf16.mxu0 %v556_v8  ;;  %v582_v25 = vld [vmem:[%s653_s23 + $0xa0] ss:$8 sps:$4 sm:$0xff]   ;;  %v583_v26 = vld [vmem:[%s653_s23 + $0xb4] ss:$8 sps:$4 sm:$0xff]   ;;  %v585_v27 = vld [vmem:[%s653_s23 + $0xb0] ss:$8 sps:$4 sm:$0xff]  }
  0x18   : > { %v586_v28 = vld [vmem:[%s653_s23 + $0xc4] ss:$8 sps:$4 sm:$0xff]   ;;  %v588_v29 = vld [vmem:[%s653_s23 + $0xc0] ss:$8 sps:$4 sm:$0xff]   ;;  %v589_v30 = vld [vmem:[%s653_s23 + $0xd4] ss:$8 sps:$4 sm:$0xff]  }
  0x19   : > { %v591_v31 = vld [vmem:[%s653_s23 + $0xd0] ss:$8 sps:$4 sm:$0xff]   ;;  %v592_v32 = vld [vmem:[%s653_s23 + $0xe4] ss:$8 sps:$4 sm:$0xff]   ;;  %v594_v33 = vld [vmem:[%s653_s23 + $0xe0] ss:$8 sps:$4 sm:$0xff]  }
  0x1a   : > { %392 = vmatpush1.bf16.msra.mxu0 %v558_v9  ;;  %v595_v34 = vld [vmem:[%s653_s23 + $0xf4] ss:$8 sps:$4 sm:$0xff]   ;;  %v597_v35 = vld [vmem:[%s653_s23 + $0xf0] ss:$8 sps:$4 sm:$0xff]  }
  0x1b   : > { %393 = vmatprep.subr.bf16.mxu0 %v559_v10 }
  0x1e   : > { %394 = vmatpush1.bf16.msra.mxu0 %v561_v11 }
  0x1f   : > { %395 = vmatprep.subr.bf16.mxu0 %v562_v12 }
  0x22   : > { %396 = vmatpush1.bf16.msra.mxu0 %v564_v13 }
  0x23   : > { %397 = vmatprep.subr.bf16.mxu0 %v565_v14 }
  0x26   : > { %398 = vmatpush1.bf16.msra.mxu0 %v567_v15 }
  0x27   : > { %399 = vmatprep.subr.bf16.mxu0 %v568_v16 }
  0x2a   : > { %400 = vmatpush1.bf16.msra.mxu0 %v570_v17 }
  0x2b   : > { %401 = vmatprep.subr.bf16.mxu0 %v571_v18 }
  0x2e   : > { %402 = vmatpush1.bf16.msra.mxu0 %v573_v19 }
  0x2f   : > { %403 = vmatprep.subr.bf16.mxu0 %v574_v20 }
  0x32   : > { %404 = vmatpush1.bf16.msra.mxu0 %v576_v21 }
  0x33   : > { %405 = vmatprep.subr.bf16.mxu0 %v577_v22 }
  0x36   : > { %406 = vmatpush1.bf16.msra.mxu0 %v579_v23 }
  0x37   : > { %407 = vmatprep.subr.bf16.mxu0 %v580_v24 }
  0x3a   : > { %408 = vmatpush1.bf16.msra.mxu0 %v582_v25 }
  0x3b   : > { %409 = vmatprep.subr.bf16.mxu0 %v583_v26 }
  0x3e   : > { %410 = vmatpush1.bf16.msra.mxu0 %v585_v27 }
  0x3f   : > { %411 = vmatprep.subr.bf16.mxu0 %v586_v28 }
  0x42   : > { %412 = vmatpush1.bf16.msra.mxu0 %v588_v29 }
  0x43   : > { %413 = vmatprep.subr.bf16.mxu0 %v589_v30 }
  0x46   : > { %414 = vmatpush1.bf16.msra.mxu0 %v591_v31 }
  0x47   : > { %415 = vmatprep.subr.bf16.mxu0 %v592_v32 }
  0x4a   : > { %416 = vmatpush1.bf16.msra.mxu0 %v594_v33 }
  0x4b   : > { %417 = vmatprep.subr.bf16.mxu0 %v595_v34 }
  0x4e   : > { %418 = vmatpush1.bf16.msra.mxu0 %v597_v35 }
  0x51   : > { %420 = vmatmul.mubr.bf16.vlgmr.msra.gmra.mrb[0].mxu0 %v598_v36 }
  0x86   : > { %v210_v37 = vpop.permute.xlu0 %209 }
  0x8a   : > { %v215_v41 = vpop.permute.xlu0 %214 }
 0x124   : > { %v421_v38 = vpop.f32.mrb[0].mxu0 }
 0x125   : > { %v422_v39 = vadd.f32 %v421_v38, %v210_v37  ;;  %v423_v40 = vpop.f32.mrb[1].mxu0 }
 0x126   : > { %v424_v42 = vadd.f32 %v423_v40, %v210_v37  ;;  %v425_v43 = vpop.f32.mrb[2].mxu0 }
 0x127   : > { %v430_v44 = vmax.f32 %v422_v39, 0.0  ;;  %v426_v45 = vadd.f32 %v425_v43, %v215_v41  ;;  %v427_v46 = vpop.f32.mrb[3].mxu0 }
 0x128   : > { %v431_v47 = vmax.f32 %v424_v42, 0.0  ;;  %v428_v48 = vadd.f32 %v427_v46, %v215_v41 }
 0x129   : > { %434 = vst [vmem:[%s170_s29] sm:$0xff] %v430_v44  ;;  %v432_v49 = vmax.f32 %v426_v45, 0.0 }
 0x12a   : > { %435 = vst [vmem:[%s170_s29 + $0x8] sm:$0xff] %v431_v47  ;;  %v433_v50 = vmax.f32 %v428_v48, 0.0 }
 0x12b   : > { %436 = vst [vmem:[%s170_s29 + $0x10] sm:$0xff] %v432_v49 }
 0x12c   : > { %437 = vst [vmem:[%s170_s29 + $0x18] sm:$0xff] %v433_v50 }
 0x12d PF: > { %s13_s12 = sadd.s32 1, %s607_s12  }
 0x12e   : > { %p10_p4 = scmp.ge.s32.totalorder %s13_s12, 4  }
 0x130   :  { %12 = sbr.rel (!%p10_p4) target bundleno = 1 (0x1), region = 62 }

// kernel: _predicates_loss.9
= control target key start
LH: loop header
LB: loop body
LE: loop exit
PB: predicated region body
PF: predicated region fallthrough
CT: control target
= control target key end

     0   :  { %v573_v1 = vmov 0.0   ;;  %vm574_vm0 = vmmov 0   ;;  %vm266_vm1 = vcmask 523264   ;;  %vm330_vm2 = vcmask 261120   ;;  %s745_s1 = inlined_call_operand.vmem [shape: bf16[256,64], index: 1, kind: input, shape index: {}]   ;;  %s746_s0 = inlined_call_operand.vmem [shape: bf16[8,256], index: 0, kind: input, shape index: {}]   ;;  %s747_s3 = inlined_call_operand.vmem [shape: bf16[64,32], index: 3, kind: input, shape index: {}]   ;;  %s748_s5 = inlined_call_operand.vmem [shape: bf16[32,128], index: 5, kind: input, shape index: {}]   ;;  %s749_s2 = inlined_call_operand.vmem [shape: f32[1,64], index: 2, kind: input, shape index: {}]   ;;  %s750_s8 = inlined_call_operand.vmem [shape: bf16[32,128], index: 8, kind: input, shape index: {}]   ;;  %s751_s4 = inlined_call_operand.vmem [shape: f32[1,32], index: 4, kind: input, shape index: {}]   ;;  %s752_s7 = inlined_call_operand.vmem [shape: bf16[8,32], index: 7, kind: input, shape index: {}]   ;;  %s753_s6 = inlined_call_operand.vmem [shape: f32[1,128], index: 6, kind: input, shape index: {}]   ;;  %s754_s10 = inlined_call_operand.vmem [shape: f32[8,128], index: 10, kind: output, shape index: {0}]   ;;  %s755_s9 = inlined_call_operand.vmem [shape: f32[1,128], index: 9, kind: input, shape index: {}]   ;;  %s756_s11 = inlined_call_operand.vmem [shape: f32[8,128], index: 11, kind: output, shape index: {1}]  }
   0x1   :  { %v547_v0 = vld [vmem:[%s745_s1 + $0x40] sm:$0xff]   ;;  %517 = vmatprep.subr.bf16.mxu1 %v573_v1  ;;  %v549_v3 = vld [vmem:[%s745_s1 + $0x48] sm:$0xff]   ;;  %v551_v5 = vld [vmem:[%s745_s1 + $0x50] sm:$0xff]   ;;  %525 = vmatprep.mubr.msk.bf16.mxu1 %vm574_vm0, %v573_v1 }
   0x2   :  { %v548_v2 = vld [vmem:[%s745_s1] sm:$0xff]   ;;  %484 = vmatprep.subr.bf16.mxu0 %v547_v0  ;;  %v550_v4 = vld [vmem:[%s745_s1 + $0x8] sm:$0xff]   ;;  %v552_v6 = vld [vmem:[%s745_s1 + $0x10] sm:$0xff]  }
   0x3   :  { %485 = vmatpush3.bf16.msra.mxu0 %v548_v2  ;;  %v553_v7 = vld [vmem:[%s745_s1 + $0x58] sm:$0xff]   ;;  %v555_v9 = vld [vmem:[%s745_s1 + $0x60] sm:$0xff]   ;;  %v557_v11 = vld [vmem:[%s745_s1 + $0x68] sm:$0xff]  }
   0x4   :  { %486 = vmatprep.subr.bf16.mxu0 %v549_v3  ;;  %v554_v8 = vld [vmem:[%s745_s1 + $0x18] sm:$0xff]   ;;  %v556_v10 = vld [vmem:[%s745_s1 + $0x20] sm:$0xff]   ;;  %v558_v15 = vld [vmem:[%s745_s1 + $0x28] sm:$0xff]  }
   0x5   :  { %v50_v12 = vld [vmem:[%s746_s0] sm:$0xff]  ;;  %v559_v16 = vld [vmem:[%s745_s1 + $0x70] sm:$0xff]   ;;  %v566_v17 = vld [vmem:[%s747_s3 + $0x8] sm:$0xff]  }
   0x6   :  { %v453_v13 = vcombine.high %v50_v12, %v50_v12  ;;  %v565_v14 = vld [vmem:[%s747_s3] sm:$0xff]   ;;  %v560_v18 = vld [vmem:[%s745_s1 + $0x30] sm:$0xff]   ;;  %v561_v19 = vld [vmem:[%s745_s1 + $0x78] sm:$0xff]   ;;  %v452_v21 = vcombine.low %v50_v12, %v50_v12 }
   0x7   :  { %487 = vmatpush3.bf16.msra.mxu0 %v550_v4  ;;  %518 = vmatpush3.bf16.msra.mxu1 %v565_v14  ;;  %v562_v20 = vld [vmem:[%s745_s1 + $0x38] sm:$0xff]   ;;  %v567_v22 = vld [vmem:[%s747_s3 + $0x10] sm:$0xff]   ;;  %v451_v25 = vld [vmem:[%s749_s2] ss:$0 sm:$0xff] }
   0x8   :  { %488 = vmatprep.subr.bf16.mxu0 %v551_v5  ;;  %225 = vmatprep.mubr.bf16.mxu0 %v453_v13  ;;  %v568_v23 = vld [vmem:[%s747_s3 + $0x18] sm:$0xff]   ;;  %v569_v32 = vld [vmem:[%s748_s5] sm:$0xff]   ;;  %v570_v34 = vld [vmem:[%s748_s5 + $0x8] sm:$0xff]  }
   0x9   :  { %519 = vmatprep.subr.bf16.mxu1 %v573_v1  ;;  %v470_v35 = vld [vmem:[%s751_s4] ss:$0 sm:$0xff]  ;;  %v572_v43 = vld [vmem:[%s750_s8 + $0x8] sm:$0xff]  }
   0xa   :  { %v571_v40 = vld [vmem:[%s750_s8] sm:$0xff]  }
   0xb   :  { %489 = vmatpush3.bf16.msra.mxu0 %v552_v6  ;;  %520 = vmatpush3.bf16.msra.mxu1 %v566_v17  ;;  %v375_v44 = vld [vmem:[%s752_s7] sm:$0xf] }
   0xc   :  { %490 = vmatprep.subr.bf16.mxu0 %v553_v7  ;;  %521 = vmatprep.subr.bf16.mxu1 %v573_v1  ;;  %v476_v45 = vld [vmem:[%s753_s6] ss:$0 sm:$0xff] }
   0xd   :  { %v480_v51 = vld [vmem:[%s755_s9] ss:$0 sm:$0xff] }
   0xf   :  { %491 = vmatpush3.bf16.msra.mxu0 %v554_v8  ;;  %522 = vmatpush3.bf16.msra.mxu1 %v567_v22 }
  0x10   :  { %492 = vmatprep.subr.bf16.mxu0 %v555_v9  ;;  %523 = vmatprep.subr.bf16.mxu1 %v573_v1 }
  0x13   :  { %493 = vmatpush3.bf16.msra.mxu0 %v556_v10  ;;  %524 = vmatpush3.bf16.msra.mxu1 %v568_v23 }
  0x14   :  { %494 = vmatprep.subr.bf16.mxu0 %v557_v11  ;;  %529 = vmatprep.subr.bf16.mxu1 %v573_v1 }
  0x17   :  { %495 = vmatpush3.bf16.msra.mxu0 %v558_v15 }
  0x18   :  { %496 = vmatprep.subr.bf16.mxu0 %v559_v16 }
  0x1b   :  { %497 = vmatpush3.bf16.msra.mxu0 %v560_v18 }
  0x1c   :  { %498 = vmatprep.subr.bf16.mxu0 %v561_v19 }
  0x1f   :  { %499 = vmatpush3.bf16.msra.mxu0 %v562_v20 }
  0x22   :  { %226 = vmatmul.mubr.bf16.vlgmr.msra.gmra.mrb[0].mxu0 %v452_v21 }
  0xf5   :  { %v500_v24 = vpop.f32.mrb[0].mxu0 }
  0xf6   :  { %v501_v26 = vpop.f32.mrb[1].mxu0 }
  0xf7   :  { %v502_v27 = vadd.f32 %v501_v26, %v500_v24  ;;  %v503_v28 = vpop.f32.mrb[2].mxu0 }
  0xf8   :  { %v504_v29 = vpop.f32.mrb[3].mxu0 }
  0xf9   :  { %v228_v30 = vadd.f32 %v502_v27, %v451_v25 }
  0xfb   :  { %v233_v31 = vmax.f32 %v228_v30, 0.0 }
  0xfd   :  { %v234_v33 = vpack.c.bf16 %v233_v31, %v233_v31 }
  0xff   :  { %526 = vmatmul.mubr.msk.bf16.vlgmr.msra.gmra.mrb[0].mxu1 %vm266_vm1, %v234_v33 }
 0x100   :  { %530 = vmatpush3.bf16.msra.mxu1 %v569_v32  ;;  %533 = vmatprep.mubr.msk.bf16.mxu1 %vm574_vm0, %v573_v1 }
 0x101   :  { %531 = vmatprep.subr.bf16.mxu1 %v573_v1 }
 0x104   :  { %532 = vmatpush3.bf16.msra.mxu1 %v570_v34 }
 0x105   :  { %537 = vmatprep.subr.bf16.mxu1 %v573_v1 }
 0x1d2   :  { %v304_v36 = vpop.f32.mrb[0].mxu1 }
 0x1d3   :  { %v305_v37 = vadd.f32 %v470_v35, %v304_v36  ;;  %v527_v38 = vpop.f32.mrb[1].mxu1 }
 0x1d4   :  { %v307_v39 = vpop.f32.mrb[2].mxu1 }
 0x1d5   :  { %v310_v41 = vpack.c.bf16 %v305_v37, %v305_v37  ;;  %v528_v42 = vpop.f32.mrb[3].mxu1 }
 0x1d7   :  { %534 = vmatmul.mubr.msk.bf16.vlgmr.msra.gmra.mrb[4].mxu1 %vm330_vm2, %v310_v41 }
 0x1d8   :  { %538 = vmatpush3.bf16.msra.mxu1 %v571_v40  ;;  %541 = vmatprep.mubr.msk.bf16.mxu1 %vm574_vm0, %v573_v1 }
 0x1d9   :  { %539 = vmatprep.subr.bf16.mxu1 %v573_v1 }
 0x1dc   :  { %540 = vmatpush3.bf16.msra.mxu1 %v572_v43 }
 0x1df   :  { %542 = vmatmul.mubr.msk.bf16.vlgmr.msra.gmra.mrb[8].mxu1 %vm330_vm2, %v375_v44 }
 0x2aa   :  { %v368_v46 = vpop.f32.mrb[4].mxu1 }
 0x2ab   :  { %v369_v47 = vadd.f32 %v476_v45, %v368_v46  ;;  %v535_v48 = vpop.f32.mrb[5].mxu1 }
 0x2ac   :  { %v371_v49 = vpop.f32.mrb[6].mxu1 }
 0x2ad   :  { %374 = vst [vmem:[%s754_s10] sm:$0xff] %v369_v47  ;;  %v536_v50 = vpop.f32.mrb[7].mxu1 }
 0x2b2   :  { %v436_v52 = vpop.f32.mrb[8].mxu1 }
 0x2b3   :  { %v437_v53 = vadd.f32 %v480_v51, %v436_v52  ;;  %v543_v54 = vpop.f32.mrb[9].mxu1 }
 0x2b4   :  { %v439_v55 = vpop.f32.mrb[10].mxu1 }
 0x2b5   :  { %442 = vst [vmem:[%s756_s11] sm:$0xff] %v437_v53  ;;  %v544_v56 = vpop.f32.mrb[11].mxu1 }

</bundles_post_ra>
